<compile_context>
chip_gen: v6e
topology: v6e:2x2x1
jax: 0.10.0
libtpu: 0.0.40
codegen_flags: <defaults>
</compile_context>

<pallas_src>
import functools

import jax
import jax.numpy as jnp
from jax.experimental import pallas as pl
from jax.experimental.pallas import tpu as pltpu


# ----------------------------------------------------------------------------
# Pallas kernel
# ----------------------------------------------------------------------------
def _gap_kernel(x_ref, o_ref, acc_ref, *, inv_hw):
    """Global-average-pool partial reduction.

    x_ref  : (1, tc, tk)  activation tile (batch slice, channel tile, HW tile)
    o_ref  : (1, 1, tc)   output tile, written once on the last HW step
    acc_ref: (1, tc)      f32 accumulator, resident across the HW grid axis
    """
    k = pl.program_id(2)

    @pl.when(k == 0)
    def _():
        acc_ref[...] = jnp.zeros_like(acc_ref)

    # Partial sum over the lane (HW) axis of this tile; accumulate in f32.
    acc_ref[...] += jnp.sum(x_ref[...].astype(jnp.float32), axis=-1)

    @pl.when(k == pl.num_programs(2) - 1)
    def _():
        o_ref[...] = (acc_ref[...] * inv_hw).astype(o_ref.dtype).reshape(o_ref.shape)


# ----------------------------------------------------------------------------
# Wrapper
# ----------------------------------------------------------------------------
def _largest_divisor_tile(dim, unit, max_tile):
    """Largest multiple of `unit` that divides `dim` and is <= max_tile."""
    best = None
    t = unit
    while t <= max_tile:
        if dim % t == 0:
            best = t
        t += unit
    return best


def _pad_to(dim, unit):
    return ((dim + unit - 1) // unit) * unit


def aggregate(x, *, vmem_elem_budget=1 << 20):
    """AdaptiveAvgPool2d(1) + squeeze(2).squeeze(2): [N, C, H, W] -> [N, C]."""
    N, C, H, W = x.shape
    HW = H * W
    inv_hw = 1.0 / float(HW)

    x3 = x.reshape(N, C, HW)  # free view: collapses the contiguous H, W dims

    # ---- channel tile (sublane axis of the input block, lane axis of output) --
    # Keep the output block legal and lane-dense: tc must be a multiple of 128
    # or equal to the (possibly padded) full channel dim.
    c_pad = C
    if C % 128 == 0:
        tc = _largest_divisor_tile(C, 128, 512)
    elif C <= 2048:
        tc = C  # full-dim block: exempt from the (8, 128) alignment rule
    else:
        c_pad = _pad_to(C, 128)
        x3 = jnp.pad(x3, ((0, 0), (0, c_pad - C), (0, 0)))
        tc = _largest_divisor_tile(c_pad, 128, 512)

    # ---- spatial tile (lane axis of the input block) --------------------------
    # tk must be a multiple of 128 or equal the (possibly padded) full HW dim.
    # Bound tc*tk to ~4 MiB f32 per buffer (~8 MiB double-buffered): big enough
    # to hit the HBM roofline, small enough for every chip's scoped-VMEM default.
    max_tk = max(128, (max(128, vmem_elem_budget // max(tc, 1)) // 128) * 128)
    hw_pad = HW
    if HW % 128 == 0:
        tk = _largest_divisor_tile(HW, 128, max_tk)
    elif HW <= max_tk:
        tk = HW  # full-dim block: exempt from the (., 128) alignment rule
    else:
        # Ragged and large: zero-pad HW to a multiple of 128. Zeros do not
        # change the sum; we divide by the true HW below.
        hw_pad = _pad_to(HW, 128)
        x3 = jnp.pad(x3, ((0, 0), (0, 0), (0, hw_pad - HW)))
        tk = _largest_divisor_tile(hw_pad, 128, max_tk)

    grid = (N, c_pad // tc, hw_pad // tk)
    kernel = functools.partial(_gap_kernel, inv_hw=inv_hw)

    out = pl.pallas_call(
        kernel,
        out_shape=jax.ShapeDtypeStruct((N, 1, c_pad), x.dtype),
        grid=grid,
        in_specs=[pl.BlockSpec((1, tc, tk), lambda n, i, k: (n, i, k))],
        out_specs=pl.BlockSpec((1, 1, tc), lambda n, i, k: (n, 0, i)),
        scratch_shapes=[pltpu.VMEM((1, tc), jnp.float32)],
        compiler_params=pltpu.CompilerParams(
            dimension_semantics=("parallel", "parallel", "arbitrary")),
    )(x3)

    out = out.reshape(N, c_pad)
    if c_pad != C:
        out = out[:, :C]
    return out


# ----------------------------------------------------------------------------
# Self-test
# ----------------------------------------------------------------------------
if __name__ == "__main__":
    key = jax.random.PRNGKey(0)
    x = jax.random.normal(key, (2, 4, 16, 16), jnp.float32)  # NCHW like PyTorch

    fwd = jax.jit(aggregate)
    out = jax.block_until_ready(fwd(x))

    ref = jnp.mean(x, axis=(2, 3))  # AdaptiveAvgPool2d(1) + squeeze reference
    assert out.shape == (2, 4), out.shape
    assert bool(jnp.all(jnp.isfinite(out)))
    assert bool(jnp.allclose(out, ref, atol=1e-5, rtol=1e-5)), \
        float(jnp.max(jnp.abs(out - ref)))
    print("KERNEL_OK")
</pallas_src>

<mosaic_0001>
module attributes {stable_mosaic.version = 11 : i64} {
  func.func @_gap_kernel(%arg0: i32, %arg1: i32, %arg2: i32, %arg3: memref<1x4x256xf32, #tpu.memory_space<vmem>>, %arg4: memref<1x1x4xf32, #tpu.memory_space<vmem>>, %arg5: memref<1x4xf32, #tpu.memory_space<vmem>>) attributes {dimension_semantics = [#tpu.dimension_semantics<parallel>, #tpu.dimension_semantics<parallel>, #tpu.dimension_semantics<arbitrary>], iteration_bounds = array<i64: 2, 1, 1>, scalar_prefetch = 0 : i64, scratch_operands = 1 : i64, tpu.core_type = #tpu.core_type<tc>, window_params = [{transform_indices = @transform_0, window_bounds = array<i64: 1, 4, 256>}, {transform_indices = @transform_1, window_bounds = array<i64: 1, 1, 4>}]} {
    %c0_i32 = arith.constant 0 : i32
    %0 = arith.cmpi eq, %arg2, %c0_i32 : i32
    %1 = arith.extui %0 : i1 to i32
    %c0_i32_0 = arith.constant 0 : i32
    %2 = arith.cmpi ne, %1, %c0_i32_0 : i32
    scf.if %2 {
      %cst_9 = arith.constant 0.000000e+00 : f32
      %11 = vector.broadcast %cst_9 : f32 to vector<1x4xf32>
      %c0_10 = arith.constant 0 : index
      %c0_11 = arith.constant 0 : index
      %12 = vector.load %arg5[%c0_10, %c0_11] : memref<1x4xf32, #tpu.memory_space<vmem>>, vector<1x4xf32>
      tpu.vector_store %arg5[%c0_10, %c0_11], %11 {strides = array<i32>} : memref<1x4xf32, #tpu.memory_space<vmem>>, vector<1x4xf32>,
    } else {
    }
    %c0 = arith.constant 0 : index
    %c0_1 = arith.constant 0 : index
    %3 = vector.load %arg5[%c0, %c0_1] : memref<1x4xf32, #tpu.memory_space<vmem>>, vector<1x4xf32>
    %c0_2 = arith.constant 0 : index
    %c0_3 = arith.constant 0 : index
    %c0_4 = arith.constant 0 : index
    %4 = vector.load %arg3[%c0_2, %c0_3, %c0_4] : memref<1x4x256xf32, #tpu.memory_space<vmem>>, vector<1x4x256xf32>
    %cst = arith.constant dense<0.000000e+00> : vector<1x4xf32>
    %5 = vector.multi_reduction <add>, %4, %cst [2] : vector<1x4x256xf32> to vector<1x4xf32>
    %6 = arith.addf %3, %5 : vector<1x4xf32>
    %c0_5 = arith.constant 0 : index
    %c0_6 = arith.constant 0 : index
    %7 = vector.load %arg5[%c0_5, %c0_6] : memref<1x4xf32, #tpu.memory_space<vmem>>, vector<1x4xf32>
    tpu.vector_store %arg5[%c0_5, %c0_6], %6 {strides = array<i32>} : memref<1x4xf32, #tpu.memory_space<vmem>>, vector<1x4xf32>,
    %c0_i32_7 = arith.constant 0 : i32
    %8 = arith.cmpi eq, %arg2, %c0_i32_7 : i32
    %9 = arith.extui %8 : i1 to i32
    %c0_i32_8 = arith.constant 0 : i32
    %10 = arith.cmpi ne, %9, %c0_i32_8 : i32
    scf.if %10 {
      %c0_9 = arith.constant 0 : index
      %c0_10 = arith.constant 0 : index
      %11 = vector.load %arg5[%c0_9, %c0_10] : memref<1x4xf32, #tpu.memory_space<vmem>>, vector<1x4xf32>
      %cst_11 = arith.constant 3.906250e-03 : f32
      %12 = vector.broadcast %cst_11 : f32 to vector<1x4xf32>
      %13 = arith.mulf %11, %12 : vector<1x4xf32>
      %14 = vector.shape_cast %13 : vector<1x4xf32> to vector<1x1x4xf32>
      %c0_12 = arith.constant 0 : index
      %c0_13 = arith.constant 0 : index
      %c0_14 = arith.constant 0 : index
      %15 = vector.load %arg4[%c0_12, %c0_13, %c0_14] : memref<1x1x4xf32, #tpu.memory_space<vmem>>, vector<1x1x4xf32>
      tpu.vector_store %arg4[%c0_12, %c0_13, %c0_14], %14 {strides = array<i32>} : memref<1x1x4xf32, #tpu.memory_space<vmem>>, vector<1x1x4xf32>,
    } else {
    }
    return
  }
  func.func @transform_0(%arg0: i32, %arg1: i32, %arg2: i32) -> (i32, i32, i32) {
    %c0_i32 = arith.constant 0 : i32
    return %arg0, %arg1, %arg2 : i32, i32, i32
  }
  func.func @transform_1(%arg0: i32, %arg1: i32, %arg2: i32) -> (i32, i32, i32) {
    %c0_i32 = arith.constant 0 : i32
    %c0_i32_0 = arith.constant 0 : i32
    return %arg0, %c0_i32, %arg1 : i32, i32, i32
  }
}

</mosaic_0001>

<bundles_post_ra>
// kernel: aggregate.1
= control target key start
LH: loop header
LB: loop body
LE: loop exit
PB: predicated region body
PF: predicated region fallthrough
CT: control target
= control target key end

     0   :  { %6 = vsyncpa [#allocation4], 0  ;;  %s614_s0 = inlined_call_operand.vmem [shape: f32[2,4,256], index: 0, kind: input, shape index: {}]   ;;  %s615_s1 = inlined_call_operand.hbm [shape: f32[2,1,4], index: 1, kind: output, shape index: {}]  }
   0x1   :  { %8 = vsyncpa [#allocation4 + $0x1], 0  ;;  %s512_s6 = smov 0   ;;  %s514_s7 = smov 0  }
   0x2   :  { %s516_s8 = smov 0   ;;  %s518_s9 = smov 0  }
   0x3   :  { %s520_s10 = smov 0   ;;  %s522_s11 = smov 0  }
   0x4 LB: > { %s349_s12 = sadd.s32 4294967295, %s496_s11   ;;  %s350_s13 = sadd.s32 4294967294, %s496_s11   ;;  %s496_s11 = sphi %s522_s11, %s14_s11   ;;  %s492_s10 = sphi %s520_s10, %s622_s10   ;;  %s488_s9 = sphi %s518_s9, %s621_s9   ;;  %s484_s8 = sphi %s516_s8, %s620_s8   ;;  %s480_s7 = sphi %s514_s7, %s619_s7   ;;  %s476_s6 = sphi %s512_s6, %s618_s6  }
   0x5   : > { %s33_s14 = sadd.s32 1, %s492_s10  ;;  %s72_s15 = sadd.s32 1, %s484_s8 }
   0x6   : > { %p35_p0 = scmp.ge.s32.totalorder %s33_s14, 2  ;;  %p82_p1 = scmp.ne.s32.totalorder %s484_s8, %s480_s7 }
   0x7   : > { %p83_p2 = scmp.eq.s32.totalorder %s349_s12, 1  ;;  %p88_p3 = scmp.ne.s32.totalorder %s480_s7, %s476_s6 }
   0x8   : > { %s624_s14 = smov (%p35_p0, %s33_s14), 0  ;;  %p89_p5 = scmp.eq.s32.totalorder %s350_s13, 1 }
   0x9   : > { %p552_p4 = por %p83_p2, %p82_p1  ;;  %s67_s17 = ssub.s32 %s492_s10, %s624_s14 }
   0xa   : > { %p353_p6 = scmp.ge.s32.totalorder %s496_s11, 1  ;;  %p70_p7 = scmp.eq.s32.totalorder %s67_s17, 0 }
   0xb   : > { %p559_p8 = por %p89_p5, %p88_p3  ;;  %p124_p9 = scmp.lt.s32.totalorder %s496_s11, 3 }
   0xc   : > { %s565_s19 = scalar_select %p70_p7, %s484_s8, %s72_s15  }
   0xd   : > { %p125_p10 = pnand %p353_p6, %p124_p9 }
   0xe   : > { %p152_p11 = scmp.lt.s32.totalorder (!%p125_p10), %s488_s9, 1  ;;  %s149_s25 = sand.u32 (!%p125_p10), 1, %s480_s7  }
   0xf   : > { %128 = sbr.rel (%p125_p10) target bundleno = 333 (0x14d), region = 24  ;;  %s356_s26 = sshll.u32 (!%p125_p10), %s488_s9, 4 }
  0x10   : > { %s150_s27 = scalar_lea.vmem (!%p125_p10), [#allocation3], %s149_s25  ;;  %s268_s2 = scalar_lea.hbm (!%p125_p10), %s615_s1, %s356_s26 }
  0x11   : > { %s270_s28 = sshll.u32 (!%p125_p10), %s150_s27, 4  ;;  %s257_s3 = scalar_lea.sflag (!%p125_p10), [#allocation4], %s149_s25  ;;  %s271_s28 = int_to_ptr.vmem [resolvable:$true] %s270_s28 }
  0x12   : > { %s420_s4 = scalar_lea.vmem (!%p125_p10), %s271_s28, 16  ;;  %s501_s5 = smov (!%p125_p10), [#allocation3]  }
  0x13   : > { %p421_p12 = scmp.ne.s32.totalorder (!%p125_p10), %s271_s28, %s420_s4  ;;  %s424_s12 = sshll.u32 (!%p125_p10), %s501_s5, 4  ;;  %s425_s12 = int_to_ptr.vmem [resolvable:$false] %s424_s12 }
  0x14   : > { %s153_s20 = scalar_select %p152_p11, %s488_s9, 1  ;;  %vm176_vm0 = vcmask 1043456   ;;  %v498_v5 = vmov 0   ;;  %v183_v6 = vlaneseq  ;;  %v499_v10 = vmov 1966171168  }
  0x15   : > { %418 = vset.pattern.permute.xlu0 %v498_v5  ;;  %v202_v11 = vunpack.c.l.s4 %v499_v10  ;;  %vm169_vm1 = vcmask 24576   ;;  %v500_v27 = vmov 0.0   ;;  %p422_p13 = pnand %p421_p12, %p552_p4  ;;  %s426_s9 = scalar_lea.vmem %s425_s12, 32 }
  0x16   : > { %s359_s21 = sshll.u32 %s153_s20, 3  ;;  %v184_v7 = vshrl.u32 %v183_v6, 7  ;;  %v227_v8 = vand.u32 127, %v183_v6  ;;  %170 = vst.msk [vmem:[#allocation2] sm:$0x1] %vm169_vm1, %v500_v27  ;;  %p427_p1 = scmp.lt.s32.totalorder %s271_s28, %s425_s12 }
  0x17   : > { %s163_s24 = scalar_lea.vmem %s614_s0, %s359_s21  ;;  %v203_v12 = vunpack.c.0.s8 %v202_v11  ;;  %p423_p0 = pneg %p422_p13 }
  0x18   : > { %v172_v0 = vld [vmem:[%s163_s24] sm:$0xff]  ;;  %v230_v9 = vsub.s32 %v227_v8, %v184_v7  ;;  %v185_v13 = vsub.s32 0, %v184_v7  ;;  %v189_v14 = vsub.s32 1, %v184_v7  ;;  %v193_v15 = vsub.s32 2, %v184_v7  ;;  %p428_p2 = scmp.lt.s32.totalorder %s426_s9, %s420_s4 }
  0x19   : > { %v174_v1 = vcombine.high %v172_v0, %v172_v0  ;;  %v177_v2 = vsel %vm176_vm0, %v172_v0, 0.0  ;;  %v197_v16 = vsub.s32 3, %v184_v7  ;;  %v206_v18 = vsub.s32 %v203_v12, %v184_v7 }
  0x1a   : > { %p429_p3 = por %p428_p2, %p427_p1 }
  0x1b   : > { %v178_v3 = vsel %vm176_vm0, %v174_v1, 0.0 }
  0x1c   : > { %v179_v4 = vadd.f32 %v178_v3, %v177_v2  ;;  %p430_p5 = pnand %p429_p3, %p423_p0 }
  0x1d   : > { %v171_v33 = vld [vmem:[#allocation2] sm:$0x1] }
  0x1e   : > { %180 = vadd.xlane.f32.xlu0 %v179_v4 }
  0xa7   : > { %v181_v17 = vpop.xlane.xlu0 %180 }
  0xa8   : > { %v186_v19 = vrot.slane %v181_v17, %v185_v13  ;;  %v190_v20 = vrot.slane %v181_v17, %v189_v14  ;;  %v194_v21 = vrot.slane %v181_v17, %v193_v15  ;;  %v198_v22 = vrot.slane %v181_v17, %v197_v16 }
  0xaa   : > { %v199_v23 = vcombine.low %v186_v19, %v190_v20  ;;  %v200_v24 = vcombine.low %v194_v21, %v198_v22 }
  0xac   : > { %v207_v25 = vrot.slane %v199_v23, %v206_v18  ;;  %v214_v26 = vrot.slane %v200_v24, %v206_v18 }
  0xae   : > { %v215_v28 = vcombine.low %v207_v25, %v214_v26 }
  0xb0   : > { %v222_v29 = vrot.slane %v215_v28, %v206_v18 }
  0xb2   : > { %224 = vperm.xlu0 %418, %v222_v29  }
 0x12d   : > { %v225_v30 = vpop.permute.xlu0 %224 }
 0x12e   : > { %v231_v31 = vrot.slane %v225_v30, %v230_v9 }
 0x130   : > { %v238_v32 = vrot.slane %v231_v31, %v206_v18 }
 0x132   : > { %v245_v34 = vrot.slane %v238_v32, %v206_v18 }
 0x134   : > { %v247_v35 = vadd.f32 %v245_v34, %v171_v33 }
 0x136   : > { %249 = vst.msk [vmem:[#allocation2] sm:$0x1] %vm169_vm1, %v247_v35 }
 0x13d   : > { %v253_v36 = vld [vmem:[#allocation2] sm:$0x1] }
 0x13e   : > { %v254_v37 = vmul.f32 0.00390625, %v253_v36 }
 0x140   : > { %255 = vst.msk [vmem:[%s150_s27] sm:$0x1] %vm169_vm1, %v254_v37 }
 0x141   : > { %433 = shalt.err (!%p430_p5)
}
 0x142   : > { %s434_s13 = scalar_lea.hbm %s268_s2, 16  ;;  %s438_s20 = scalar_lea.hbm %s615_s1, 32 }
 0x143   : > { %p435_p6 = scmp.ne.s32.totalorder %s268_s2, %s434_s13  ;;  %p439_p10 = scmp.lt.s32.totalorder %s268_s2, %s615_s1 }
 0x144   : > { %p440_p11 = scmp.lt.s32.totalorder %s438_s20, %s434_s13 }
 0x145   : > { %p436_p7 = pnand %p435_p6, %p552_p4 }
 0x146   : > { %p441_p12 = por %p440_p11, %p439_p10 }
 0x147   : > { %p437_p9 = pneg %p436_p7 }
 0x149   : > { %p442_p13 = pnand %p441_p12, %p437_p9 }
 0x14b   : > { %445 = shalt.err (!%p442_p13)
}
 0x14c   : > { %360 = dma.vmem_to_hbm [thread:$0]  (%p552_p4), %s271_s28, 16, %s268_s2, %s257_s3  }
 0x14d PF: > { %p366_p0 = scmp.ge.s32.totalorder %s496_s11, 2  ;;  %s282_s23 = sand.u32 1, %s476_s6  }
 0x14e   : > { %s283_s24 = scalar_lea.sflag [#allocation4], %s282_s23 }
 0x14f   : > { %p363_p1 = pnand %p366_p0, %p559_p8 }
 0x151   : > { %p364_p2 = pneg %p363_p1 }
 0x153   : > { %471 = dma.done.wait (%p364_p2), %s283_s24, 16  }
 0x154   : > { %473 = vsyncadd (%p364_p2), %s283_s24, 4294967280  ;;  %s14_s11 = sadd.s32 1, %s496_s11   ;;  %s618_s6 = smov %s480_s7 }
 0x155   : > { %p11_p3 = scmp.ge.s32.totalorder %s14_s11, 4   ;;  %s619_s7 = smov %s484_s8 }
 0x156   : > { %s620_s8 = smov %s565_s19  ;;  %s621_s9 = smov %s492_s10 }
 0x157   : > { %s622_s10 = smov %s624_s14  ;;  %13 = sbr.rel (!%p11_p3) target bundleno = 4 (0x4), region = 67 }
 0x15c   :  { %287 = vsyncpa [#allocation4], 1 }
 0x15d   :  { %289 = vsyncpa [#allocation4 + $0x1], 1 }

</bundles_post_ra>
